<compile_context>
chip_gen: v7x
topology: tpu7x:2x2x1
jax: 0.10.0
libtpu: 0.0.40
codegen_flags: <defaults>
</compile_context>

<pallas_src>
import functools

import jax
import jax.numpy as jnp
from jax.experimental import pallas as pl
from jax.experimental.pallas import tpu as pltpu

# Hidden layer widths fixed by the module definition.
HIDDEN = (5, 10, 20, 10, 5)
F_MID = 24  # round_up(max(HIDDEN), 8): padded width of the small middle stack


def _round_up(x, m):
    return ((x + m - 1) // m) * m


def _pick_tiles(n, max_tile_n):
    """Pick (tile_n, n_pad): multiple-of-128 tiles, >=2 grid steps when
    possible (v7x has 2 TensorCores), minimal batch padding."""
    n128 = -(-n // 128)                      # ceil(n / 128)
    max_chunks = max(1, max_tile_n // 128)
    if n128 <= 1:
        num_tiles, chunks = 1, 1
    else:
        num_tiles = max(2, -(-n128 // max_chunks))   # at least 2 grid steps
        chunks = -(-n128 // num_tiles)               # minimize padding
    tile_n = chunks * 128
    return tile_n, num_tiles * tile_n


def _ffn_kernel(x_ref, wf_ref, bf_ref, wm_ref, bm_ref, wl_ref, bl_ref, o_ref,
                *, dim, num_mid):
    """One batch tile of the whole FFN (feature-major: batch on lanes).

    x_ref : (dim_pad, tile_n)        zero-padded input features
    wf_ref: (F_MID, dim_pad)         layer 0 (sigmoid folded -> tanh form)
    bf_ref: (F_MID, 1)
    wm_ref: (num_mid, F_MID, F_MID)  middle layers, zero-padded
    bm_ref: (num_mid, F_MID, 1)
    wl_ref: (dim_pad, F_MID)         last layer (affine only)
    bl_ref: (dim_pad, 1)
    o_ref : (dim, tile_n)
    """
    h = x_ref[...].astype(jnp.float32)
    # Layer 0: (F_MID, dim_pad) @ (dim_pad, tile_n)
    h = jnp.tanh(jnp.dot(wf_ref[...], h, preferred_element_type=jnp.float32)
                 + bf_ref[...])
    # Middle layers (static unroll, num_mid == 4, all tiny 24x24 matmuls).
    # Zero-padded rows give tanh(0)=0 and are annihilated by the next layer's
    # zero-padded columns, so padding is self-correcting.
    for l in range(num_mid):
        h = jnp.tanh(jnp.dot(wm_ref[l], h, preferred_element_type=jnp.float32)
                     + bm_ref[l])
    # Last layer: affine only; only the first `dim` rows are real output.
    out = jnp.dot(wl_ref[...], h, preferred_element_type=jnp.float32) + bl_ref[...]
    o_ref[...] = out[:dim, :].astype(o_ref.dtype)


def prepare_params(params):
    """One-time prep: zero-pad into the kernel layout and fold the sigmoid
    affine constants into the weights/biases.

      sigmoid(z) = 0.5 + 0.5 * tanh(z/2)
      layer 0     : t0 = tanh(0.5*W0 x + 0.5*b0)
      layers 1..4 : tl = tanh(0.25*Wl t_{l-1} + 0.25*Wl.1 + 0.5*bl)
      last layer  : out = 0.5*W5 t4 + 0.5*W5.1 + b5

    Call once and reuse; do NOT rebuild per forward call.
    """
    num_layers = len(params)
    num_mid = num_layers - 2
    f32 = jnp.float32

    w0, b0 = params[0]
    wl, bl = params[-1]
    dim = w0.shape[1]
    dim_pad = _round_up(dim, 8)

    # First layer: (F_MID, dim_pad), inner 0.5 folded in.
    w_first = jnp.zeros((F_MID, dim_pad), f32)
    w_first = w_first.at[:w0.shape[0], :dim].set(0.5 * w0.astype(f32))
    b_first = jnp.zeros((F_MID, 1), f32)
    b_first = b_first.at[:w0.shape[0], 0].set(0.5 * b0.astype(f32))

    # Middle layers: resident (num_mid, 24, 24) stack, independent of dim.
    w_mid = jnp.zeros((num_mid, F_MID, F_MID), f32)
    b_mid = jnp.zeros((num_mid, F_MID, 1), f32)
    for i in range(num_mid):
        w, b = params[1 + i]
        w = w.astype(f32)
        b = b.astype(f32)
        out_f, in_f = w.shape
        w_mid = w_mid.at[i, :out_f, :in_f].set(0.25 * w)
        b_mid = b_mid.at[i, :out_f, 0].set(0.5 * b + 0.25 * w.sum(axis=1))

    # Last layer: (dim_pad, F_MID), no activation.
    wlf = wl.astype(f32)
    w_last = jnp.zeros((dim_pad, F_MID), f32)
    w_last = w_last.at[:wl.shape[0], :wl.shape[1]].set(0.5 * wlf)
    b_last = jnp.zeros((dim_pad, 1), f32)
    b_last = b_last.at[:wl.shape[0], 0].set(bl.astype(f32) + 0.5 * wlf.sum(axis=1))

    return dict(w_first=w_first, b_first=b_first, w_mid=w_mid, b_mid=b_mid,
                w_last=w_last, b_last=b_last)


def deep_ffn_forward(x, t, prepped, *, max_tile_n=512):
    """x: (N, dim); t ignored (parity with forward(x, t)); prepped from
    prepare_params. Jit this wrapper."""
    del t  # forward(x, t) ignores t
    n, dim = x.shape
    w_first = prepped["w_first"]
    b_first = prepped["b_first"]
    w_mid = prepped["w_mid"]
    b_mid = prepped["b_mid"]
    w_last = prepped["w_last"]
    b_last = prepped["b_last"]
    dim_pad = w_first.shape[1]
    num_mid = w_mid.shape[0]

    tile_n, n_pad = _pick_tiles(n, max_tile_n)

    # Feature-major, minimally padded input: (dim_pad, n_pad), batch on lanes.
    # Under jit the pad+transpose fuses into a single copy.
    x_t = jnp.zeros((dim_pad, n_pad), x.dtype)
    x_t = x_t.at[:dim, :n].set(x.T)

    # Explicit scoped-VMEM budget (v5e default is only 16 MiB).
    blk_bytes = 4 * tile_n * (dim_pad + dim_pad)          # x block + out block
    wgt_bytes = 4 * (w_first.size + b_first.size + w_mid.size + b_mid.size
                     + w_last.size + b_last.size)
    vmem_need = 2 * (blk_bytes + wgt_bytes) + (2 << 20)   # double-buffered + slack
    vmem_limit = int(min(max(vmem_need, 8 << 20), 128 << 20))

    kernel = functools.partial(_ffn_kernel, dim=dim, num_mid=num_mid)

    out_t = pl.pallas_call(
        kernel,
        out_shape=jax.ShapeDtypeStruct((dim, n_pad), x.dtype),
        grid_spec=pltpu.PrefetchScalarGridSpec(
            num_scalar_prefetch=0,
            grid=(n_pad // tile_n,),
            in_specs=[
                pl.BlockSpec((dim_pad, tile_n), lambda i: (0, i)),
                # Constant-index weight/bias blocks: fetched once, stay resident.
                pl.BlockSpec((F_MID, dim_pad), lambda i: (0, 0)),
                pl.BlockSpec((F_MID, 1), lambda i: (0, 0)),
                pl.BlockSpec((num_mid, F_MID, F_MID), lambda i: (0, 0, 0)),
                pl.BlockSpec((num_mid, F_MID, 1), lambda i: (0, 0, 0)),
                pl.BlockSpec((dim_pad, F_MID), lambda i: (0, 0)),
                pl.BlockSpec((dim_pad, 1), lambda i: (0, 0)),
            ],
            out_specs=pl.BlockSpec((dim, tile_n), lambda i: (0, i)),
        ),
        compiler_params=pltpu.CompilerParams(
            dimension_semantics=("parallel",),
            vmem_limit_bytes=vmem_limit),
    )(x_t, w_first, b_first, w_mid, b_mid, w_last, b_last)

    # Back to batch-major (N, dim); padded batch columns carry junk until
    # trimmed here — keep the [:, :n] mask if this is ever changed.
    return out_t[:, :n].T


def init_params(dim, key):
    """Deterministic init mimicking PyTorch nn.Linear (W: (out,in), b: (out,))."""
    sizes = (dim,) + HIDDEN + (dim,)
    params = []
    for i in range(len(sizes) - 1):
        fan_in, fan_out = sizes[i], sizes[i + 1]
        key, kw, kb = jax.random.split(key, 3)
        bound = 1.0 / jnp.sqrt(fan_in)
        w = jax.random.uniform(kw, (fan_out, fan_in), jnp.float32, -bound, bound)
        b = jax.random.uniform(kb, (fan_out,), jnp.float32, -bound, bound)
        params.append((w, b))
    return params


def reference_forward(x, params):
    h = x
    for i, (w, b) in enumerate(params):
        h = h @ w.T + b
        if i < len(params) - 1:
            h = jax.nn.sigmoid(h)
    return h


if __name__ == "__main__":
    key = jax.random.PRNGKey(0)
    dim = 4
    batch = 8

    kx, kt, kp = jax.random.split(key, 3)
    x = jax.random.normal(kx, (batch, dim), jnp.float32)
    t = jax.random.normal(kt, (batch,), jnp.float32)  # ignored by forward
    params = init_params(dim, kp)

    prepped = prepare_params(params)           # one-time param prep (hoisted)
    fwd = jax.jit(deep_ffn_forward)

    out = jax.block_until_ready(fwd(x, t, prepped))

    ref = reference_forward(x, params)
    assert out.shape == (batch, dim)
    assert jnp.allclose(out, ref, atol=1e-5, rtol=1e-5), "mismatch vs reference"

    print("KERNEL_OK")
</pallas_src>

<mosaic_0001>
module attributes {stable_mosaic.version = 11 : i64} {
  func.func @_ffn_kernel(%arg0: i32, %arg1: memref<8x128xf32, #tpu.memory_space<vmem>>, %arg2: memref<24x8xf32, #tpu.memory_space<vmem>>, %arg3: memref<24x1xf32, #tpu.memory_space<vmem>>, %arg4: memref<4x24x24xf32, #tpu.memory_space<vmem>>, %arg5: memref<4x24x1xf32, #tpu.memory_space<vmem>>, %arg6: memref<8x24xf32, #tpu.memory_space<vmem>>, %arg7: memref<8x1xf32, #tpu.memory_space<vmem>>, %arg8: memref<4x128xf32, #tpu.memory_space<vmem>>) attributes {dimension_semantics = [#tpu.dimension_semantics<parallel>], iteration_bounds = array<i64: 1>, scalar_prefetch = 0 : i64, scratch_operands = 0 : i64, tpu.core_type = #tpu.core_type<tc>, window_params = [{transform_indices = @transform_0, window_bounds = array<i64: 8, 128>}, {pipeline_mode = #tpu.pipeline_mode<synchronous>, transform_indices = @transform_1, window_bounds = array<i64: 24, 8>}, {pipeline_mode = #tpu.pipeline_mode<synchronous>, transform_indices = @transform_2, window_bounds = array<i64: 24, 1>}, {pipeline_mode = #tpu.pipeline_mode<synchronous>, transform_indices = @transform_3, window_bounds = array<i64: 4, 24, 24>}, {pipeline_mode = #tpu.pipeline_mode<synchronous>, transform_indices = @transform_4, window_bounds = array<i64: 4, 24, 1>}, {pipeline_mode = #tpu.pipeline_mode<synchronous>, transform_indices = @transform_5, window_bounds = array<i64: 8, 24>}, {pipeline_mode = #tpu.pipeline_mode<synchronous>, transform_indices = @transform_6, window_bounds = array<i64: 8, 1>}, {transform_indices = @transform_7, window_bounds = array<i64: 4, 128>}]} {
    %c0 = arith.constant 0 : index
    %c0_0 = arith.constant 0 : index
    %0 = vector.load %arg1[%c0, %c0_0] : memref<8x128xf32, #tpu.memory_space<vmem>>, vector<8x128xf32>
    %c0_1 = arith.constant 0 : index
    %c0_2 = arith.constant 0 : index
    %1 = vector.load %arg2[%c0_1, %c0_2] : memref<24x8xf32, #tpu.memory_space<vmem>>, vector<24x8xf32>
    %cst = arith.constant dense<0.000000e+00> : vector<24x128xf32>
    %2 = tpu.matmul %1, %0, %cst {dimension_numbers = #tpu.dot_dimension_numbers<[1], [0], [0], [1], [0, 0, 1, 1], [], []>} : vector<24x8xf32>, vector<8x128xf32>, vector<24x128xf32> -> vector<24x128xf32>
    %c0_3 = arith.constant 0 : index
    %c0_4 = arith.constant 0 : index
    %3 = vector.load %arg3[%c0_3, %c0_4] : memref<24x1xf32, #tpu.memory_space<vmem>>, vector<24x1xf32>
    %4 = vector.broadcast %3 : vector<24x1xf32> to vector<24x128xf32>
    %5 = arith.addf %2, %4 : vector<24x128xf32>
    %6 = math.tanh %5 : vector<24x128xf32>
    %c0_5 = arith.constant 0 : index
    %c0_6 = arith.constant 0 : index
    %c0_7 = arith.constant 0 : index
    %7 = vector.load %arg4[%c0_5, %c0_6, %c0_7] : memref<4x24x24xf32, #tpu.memory_space<vmem>>, vector<1x24x24xf32>
    %8 = vector.shape_cast %7 : vector<1x24x24xf32> to vector<24x24xf32>
    %cst_8 = arith.constant dense<0.000000e+00> : vector<24x128xf32>
    %9 = tpu.matmul %8, %6, %cst_8 {dimension_numbers = #tpu.dot_dimension_numbers<[1], [0], [0], [1], [0, 0, 1, 1], [], []>} : vector<24x24xf32>, vector<24x128xf32>, vector<24x128xf32> -> vector<24x128xf32>
    %c0_9 = arith.constant 0 : index
    %c0_10 = arith.constant 0 : index
    %c0_11 = arith.constant 0 : index
    %10 = vector.load %arg5[%c0_9, %c0_10, %c0_11] : memref<4x24x1xf32, #tpu.memory_space<vmem>>, vector<1x24x1xf32>
    %11 = vector.shape_cast %10 : vector<1x24x1xf32> to vector<24x1xf32>
    %12 = vector.broadcast %11 : vector<24x1xf32> to vector<24x128xf32>
    %13 = arith.addf %9, %12 : vector<24x128xf32>
    %14 = math.tanh %13 : vector<24x128xf32>
    %c1 = arith.constant 1 : index
    %c0_12 = arith.constant 0 : index
    %c0_13 = arith.constant 0 : index
    %15 = vector.load %arg4[%c1, %c0_12, %c0_13] : memref<4x24x24xf32, #tpu.memory_space<vmem>>, vector<1x24x24xf32>
    %16 = vector.shape_cast %15 : vector<1x24x24xf32> to vector<24x24xf32>
    %cst_14 = arith.constant dense<0.000000e+00> : vector<24x128xf32>
    %17 = tpu.matmul %16, %14, %cst_14 {dimension_numbers = #tpu.dot_dimension_numbers<[1], [0], [0], [1], [0, 0, 1, 1], [], []>} : vector<24x24xf32>, vector<24x128xf32>, vector<24x128xf32> -> vector<24x128xf32>
    %c1_15 = arith.constant 1 : index
    %c0_16 = arith.constant 0 : index
    %c0_17 = arith.constant 0 : index
    %18 = vector.load %arg5[%c1_15, %c0_16, %c0_17] : memref<4x24x1xf32, #tpu.memory_space<vmem>>, vector<1x24x1xf32>
    %19 = vector.shape_cast %18 : vector<1x24x1xf32> to vector<24x1xf32>
    %20 = vector.broadcast %19 : vector<24x1xf32> to vector<24x128xf32>
    %21 = arith.addf %17, %20 : vector<24x128xf32>
    %22 = math.tanh %21 : vector<24x128xf32>
    %c2 = arith.constant 2 : index
    %c0_18 = arith.constant 0 : index
    %c0_19 = arith.constant 0 : index
    %23 = vector.load %arg4[%c2, %c0_18, %c0_19] : memref<4x24x24xf32, #tpu.memory_space<vmem>>, vector<1x24x24xf32>
    %24 = vector.shape_cast %23 : vector<1x24x24xf32> to vector<24x24xf32>
    %cst_20 = arith.constant dense<0.000000e+00> : vector<24x128xf32>
    %25 = tpu.matmul %24, %22, %cst_20 {dimension_numbers = #tpu.dot_dimension_numbers<[1], [0], [0], [1], [0, 0, 1, 1], [], []>} : vector<24x24xf32>, vector<24x128xf32>, vector<24x128xf32> -> vector<24x128xf32>
    %c2_21 = arith.constant 2 : index
    %c0_22 = arith.constant 0 : index
    %c0_23 = arith.constant 0 : index
    %26 = vector.load %arg5[%c2_21, %c0_22, %c0_23] : memref<4x24x1xf32, #tpu.memory_space<vmem>>, vector<1x24x1xf32>
    %27 = vector.shape_cast %26 : vector<1x24x1xf32> to vector<24x1xf32>
    %28 = vector.broadcast %27 : vector<24x1xf32> to vector<24x128xf32>
    %29 = arith.addf %25, %28 : vector<24x128xf32>
    %30 = math.tanh %29 : vector<24x128xf32>
    %c3 = arith.constant 3 : index
    %c0_24 = arith.constant 0 : index
    %c0_25 = arith.constant 0 : index
    %31 = vector.load %arg4[%c3, %c0_24, %c0_25] : memref<4x24x24xf32, #tpu.memory_space<vmem>>, vector<1x24x24xf32>
    %32 = vector.shape_cast %31 : vector<1x24x24xf32> to vector<24x24xf32>
    %cst_26 = arith.constant dense<0.000000e+00> : vector<24x128xf32>
    %33 = tpu.matmul %32, %30, %cst_26 {dimension_numbers = #tpu.dot_dimension_numbers<[1], [0], [0], [1], [0, 0, 1, 1], [], []>} : vector<24x24xf32>, vector<24x128xf32>, vector<24x128xf32> -> vector<24x128xf32>
    %c3_27 = arith.constant 3 : index
    %c0_28 = arith.constant 0 : index
    %c0_29 = arith.constant 0 : index
    %34 = vector.load %arg5[%c3_27, %c0_28, %c0_29] : memref<4x24x1xf32, #tpu.memory_space<vmem>>, vector<1x24x1xf32>
    %35 = vector.shape_cast %34 : vector<1x24x1xf32> to vector<24x1xf32>
    %36 = vector.broadcast %35 : vector<24x1xf32> to vector<24x128xf32>
    %37 = arith.addf %33, %36 : vector<24x128xf32>
    %38 = math.tanh %37 : vector<24x128xf32>
    %c0_30 = arith.constant 0 : index
    %c0_31 = arith.constant 0 : index
    %39 = vector.load %arg6[%c0_30, %c0_31] : memref<8x24xf32, #tpu.memory_space<vmem>>, vector<8x24xf32>
    %cst_32 = arith.constant dense<0.000000e+00> : vector<8x128xf32>
    %40 = tpu.matmul %39, %38, %cst_32 {dimension_numbers = #tpu.dot_dimension_numbers<[1], [0], [0], [1], [0, 0, 1, 1], [], []>} : vector<8x24xf32>, vector<24x128xf32>, vector<8x128xf32> -> vector<8x128xf32>
    %c0_33 = arith.constant 0 : index
    %c0_34 = arith.constant 0 : index
    %41 = vector.load %arg7[%c0_33, %c0_34] : memref<8x1xf32, #tpu.memory_space<vmem>>, vector<8x1xf32>
    %42 = vector.broadcast %41 : vector<8x1xf32> to vector<8x128xf32>
    %43 = arith.addf %40, %42 : vector<8x128xf32>
    %44 = vector.extract_strided_slice %43 {offsets = [0, 0], sizes = [4, 128], strides = [1, 1]} : vector<8x128xf32> to vector<4x128xf32>
    %c0_35 = arith.constant 0 : index
    %c0_36 = arith.constant 0 : index
    %45 = vector.load %arg8[%c0_35, %c0_36] : memref<4x128xf32, #tpu.memory_space<vmem>>, vector<4x128xf32>
    tpu.vector_store %arg8[%c0_35, %c0_36], %44 {strides = array<i32>} : memref<4x128xf32, #tpu.memory_space<vmem>>, vector<4x128xf32>,
    return
  }
  func.func @transform_0(%arg0: i32) -> (i32, i32) {
    %c0_i32 = arith.constant 0 : i32
    %c0_i32_0 = arith.constant 0 : i32
    return %c0_i32, %arg0 : i32, i32
  }
  func.func @transform_1(%arg0: i32) -> (i32, i32) {
    %c0_i32 = arith.constant 0 : i32
    %c0_i32_0 = arith.constant 0 : i32
    %c0_i32_1 = arith.constant 0 : i32
    return %c0_i32, %c0_i32_0 : i32, i32
  }
  func.func @transform_2(%arg0: i32) -> (i32, i32) {
    %c0_i32 = arith.constant 0 : i32
    %c0_i32_0 = arith.constant 0 : i32
    %c0_i32_1 = arith.constant 0 : i32
    return %c0_i32, %c0_i32_0 : i32, i32
  }
  func.func @transform_3(%arg0: i32) -> (i32, i32, i32) {
    %c0_i32 = arith.constant 0 : i32
    %c0_i32_0 = arith.constant 0 : i32
    %c0_i32_1 = arith.constant 0 : i32
    %c0_i32_2 = arith.constant 0 : i32
    return %c0_i32, %c0_i32_0, %c0_i32_1 : i32, i32, i32
  }
  func.func @transform_4(%arg0: i32) -> (i32, i32, i32) {
    %c0_i32 = arith.constant 0 : i32
    %c0_i32_0 = arith.constant 0 : i32
    %c0_i32_1 = arith.constant 0 : i32
    %c0_i32_2 = arith.constant 0 : i32
    return %c0_i32, %c0_i32_0, %c0_i32_1 : i32, i32, i32
  }
  func.func @transform_5(%arg0: i32) -> (i32, i32) {
    %c0_i32 = arith.constant 0 : i32
    %c0_i32_0 = arith.constant 0 : i32
    %c0_i32_1 = arith.constant 0 : i32
    return %c0_i32, %c0_i32_0 : i32, i32
  }
  func.func @transform_6(%arg0: i32) -> (i32, i32) {
    %c0_i32 = arith.constant 0 : i32
    %c0_i32_0 = arith.constant 0 : i32
    %c0_i32_1 = arith.constant 0 : i32
    return %c0_i32, %c0_i32_0 : i32, i32
  }
  func.func @transform_7(%arg0: i32) -> (i32, i32) {
    %c0_i32 = arith.constant 0 : i32
    %c0_i32_0 = arith.constant 0 : i32
    return %c0_i32, %arg0 : i32, i32
  }
}

</mosaic_0001>

<bundles_post_ra>
// kernel: deep_ffn_forward.1
= control target key start
LH: loop header
LB: loop body
LE: loop exit
PB: predicated region body
PF: predicated region fallthrough
CT: control target
= control target key end

     0   :  { %vm48_vm0 = vcmask 64512   ;;  %v884_v0 = vmov 0.0   ;;  %vm885_vm1 = vmmov 0   ;;  %v886_v7 = vmov 0   ;;  %s1090_s0 = inlined_call_operand.vmem [shape: f32[8,128], index: 0, kind: input, shape index: {}]   ;;  %s1091_s1 = inlined_call_operand.vmem [shape: f32[24,8], index: 1, kind: input, shape index: {}]   ;;  %s1092_s2 = inlined_call_operand.vmem [shape: f32[24,1], index: 2, kind: input, shape index: {}]   ;;  %s1093_s4 = inlined_call_operand.vmem [shape: f32[4,24,1], index: 4, kind: input, shape index: {}]   ;;  %s1094_s6 = inlined_call_operand.vmem [shape: f32[8,1], index: 6, kind: input, shape index: {}]   ;;  %s1095_s3 = inlined_call_operand.vmem [shape: f32[4,24,24], index: 3, kind: input, shape index: {}]   ;;  %s1096_s5 = inlined_call_operand.vmem [shape: f32[8,24], index: 5, kind: input, shape index: {}]   ;;  %s1097_s7 = inlined_call_operand.vmem [shape: f32[4,128], index: 7, kind: output, shape index: {}]  }
   0x1   :  { %751 = vmatprep.subr.mxu0 %v884_v0  ;;  %v26_v1 = vld [vmem:[%s1090_s0] sm:$0xff]  ;;  %753 = vmatprep.mubr.msk.f32.mxu0 %vm885_vm1, %v884_v0  ;;  %v29_v3 = vld [vmem:[%s1091_s1 + $0x10] sm:$0xff]  ;;  %v28_v5 = vld [vmem:[%s1091_s1 + $0x8] sm:$0xff]  ;;  %v887_v22 = vmov 0.0|0.0   ;;  %vm162_vm2 = vcmask 195584  }
   0x2   :  { %v27_v2 = vld [vmem:[%s1091_s1] sm:$0xff]  ;;  %752 = vmatpush3.msra.mxu0 %v26_v1  ;;  %846 = vmatprep.subr.mxu1 %v884_v0  ;;  %v32_v6 = vld [vmem:[%s1092_s2 + $0x10] sm:$0xff]  ;;  %v31_v8 = vld [vmem:[%s1092_s2 + $0x8] sm:$0xff] }
   0x3   :  { %754 = vmatmul.mubr.msk.f32.vlgmr.msra.gmra.mrb[0].mxu0 %vm48_vm0, %v27_v2  ;;  %847 = vmatpush3.msra.mxu1 %v26_v1  ;;  %v30_v4 = vld [vmem:[%s1092_s2] sm:$0xff]  ;;  %v145_v10 = vld [vmem:[%s1093_s4 + $0x8] sm:$0xff]  ;;  %v146_v11 = vld [vmem:[%s1093_s4 + $0x10] sm:$0xff] }
   0x4   :  { %756 = vmatprep.mubr.msk.f32.mxu0 %vm885_vm1, %v884_v0  ;;  %759 = vmatprep.mubr.msk.f32.mxu1 %vm885_vm1, %v884_v0  ;;  %v144_v9 = vld [vmem:[%s1093_s4] sm:$0xff]  ;;  %v694_v12 = vld [vmem:[%s1093_s4 + $0x18] sm:$0xff]  ;;  %v696_v14 = vld [vmem:[%s1093_s4 + $0x28] sm:$0xff] }
   0x5   :  { %760 = vmatmul.mubr.msk.f32.vlgmr.msra.gmra.mrb[0].mxu1 %vm48_vm0, %v29_v3  ;;  %852 = vset.pattern.permute.xlu0 %v886_v7  ;;  %v695_v13 = vld [vmem:[%s1093_s4 + $0x20] sm:$0xff]  ;;  %v703_v15 = vld [vmem:[%s1093_s4 + $0x30] sm:$0xff]  ;;  %v704_v16 = vld [vmem:[%s1093_s4 + $0x38] sm:$0xff] }
   0x6   :  { %35 = vperm.xlu0 %852, %v30_v4   ;;  %853 = vset.pattern.permute.xlu1 %v886_v7  ;;  %v705_v17 = vld [vmem:[%s1093_s4 + $0x40] sm:$0xff]  ;;  %v712_v18 = vld [vmem:[%s1093_s4 + $0x48] sm:$0xff]  ;;  %v713_v19 = vld [vmem:[%s1093_s4 + $0x50] sm:$0xff] }
   0x7   :  { %757 = vmatmul.mubr.msk.f32.gmra.mrb[2].mxu0 %vm48_vm0, %v28_v5  ;;  %45 = vperm.xlu1 %853, %v32_v6   ;;  %v714_v20 = vld [vmem:[%s1093_s4 + $0x58] sm:$0xff]  ;;  %v601_v21 = vld [vmem:[%s1094_s6] sm:$0xff]  ;;  %v142_v40 = vld [vmem:[%s1095_s3 + $0x8] sm:$0xff] }
   0x8   :  { %768 = vmatprep.mubr.msk.f32.mxu1 %vm885_vm1, %v884_v0  ;;  %783 = vmatprep.mubr.msk.f32.mxu0 %vm885_vm1, %v884_v0  ;;  %v141_v39 = vld [vmem:[%s1095_s3] sm:$0xff]  ;;  %v143_v41 = vld [vmem:[%s1095_s3 + $0x10] sm:$0xff]  ;;  %v691_v57 = vld [vmem:[%s1095_s3 + $0x18] sm:$0xff] }
   0x9   :  { %831 = vmatprep.subr.bf16.mxu1 %v887_v22  ;;  %834 = vmatprep.subr.bf16.mxu0 %v887_v22  ;;  %v692_v59 = vld [vmem:[%s1095_s3 + $0x20] sm:$0xff]  ;;  %v693_v60 = vld [vmem:[%s1095_s3 + $0x28] sm:$0xff] }
   0xa   :  { %40 = vperm.xlu0 %852, %v31_v8  }
   0xb   :  { %149 = vperm.xlu1 %853, %v144_v9  }
   0xe   :  { %154 = vperm.xlu0 %852, %v145_v10  }
   0xf   :  { %159 = vperm.xlu1 %853, %v146_v11  }
  0x12   :  { %265 = vperm.xlu0 %852, %v694_v12  }
  0x13   :  { %270 = vperm.xlu1 %853, %v695_v13   ;;  %v700_v13 = vld [vmem:[%s1095_s3 + $0x30] sm:$0xff] }
  0x16   :  { %275 = vperm.xlu0 %852, %v696_v14  }
  0x17   :  { %380 = vperm.xlu1 %853, %v703_v15   ;;  %v701_v15 = vld [vmem:[%s1095_s3 + $0x38] sm:$0xff] }
  0x1a   :  { %385 = vperm.xlu0 %852, %v704_v16   ;;  %v702_v16 = vld [vmem:[%s1095_s3 + $0x40] sm:$0xff] }
  0x1b   :  { %390 = vperm.xlu1 %853, %v705_v17  }
  0x1e   :  { %495 = vperm.xlu0 %852, %v712_v18  }
  0x1f   :  { %500 = vperm.xlu1 %853, %v713_v19  }
  0x22   :  { %505 = vperm.xlu0 %852, %v714_v20  }
  0x23   :  { %604 = vperm.xlu1 %853, %v601_v21  }
  0x85   :  { %v36_v23 = vpop.permute.xlu0 %35 }
  0x86   :  { %v46_v33 = vpop.permute.xlu1 %45 }
  0x89   :  { %v41_v29 = vpop.permute.xlu0 %40 }
  0x8a   :  { %v150_v43 = vpop.permute.xlu1 %149 }
  0x8d   :  { %v155_v46 = vpop.permute.xlu0 %154 }
  0x8e   :  { %v160_v50 = vpop.permute.xlu1 %159 }
  0x91   :  { %v266_v62 = vpop.permute.xlu0 %265 }
  0x92   :  { %v271_v2 = vpop.permute.xlu1 %270 }
  0x95   :  { %v276_v6 = vpop.permute.xlu0 %275 }
  0x96   :  { %v381_v18 = vpop.permute.xlu1 %380 }
  0x99   :  { %v386_v21 = vpop.permute.xlu0 %385 }
  0xd6   :  { %v124_v24 = vpop.f32.mrb[0].mxu0 }
  0xd7   :  { %v755_v25 = vpop.f32.mrb[1].mxu0  ;;  %v125_v26 = vadd.f32 %v124_v24, %v36_v23 }
  0xd8   :  { %v134_v27 = vpop.f32.mrb[0].mxu1  ;;  %v391_v25 = vpop.permute.xlu1 %390 }
  0xd9   :  { %v761_v28 = vpop.f32.mrb[1].mxu1  ;;  %854 = vtanh.f32 %v125_v26  ;;  %v135_v34 = vadd.f32 %v134_v27, %v46_v33 }
  0xda   :  { %v129_v30 = vpop.f32.mrb[2].mxu0 }
  0xdb   :  { %v130_v31 = vadd.f32 %v129_v30, %v41_v29  ;;  %v758_v32 = vpop.f32.mrb[3].mxu0 }
  0xdc   :  { %v709_v32 = vld [vmem:[%s1095_s3 + $0x48] sm:$0xff] }
  0xdd   :  { %856 = vtanh.f32 %v130_v31 }
  0xde   :  { %858 = vtanh.f32 %v135_v34  ;;  %v710_v34 = vld [vmem:[%s1095_s3 + $0x50] sm:$0xff] }
  0xe3   :  { %v855_v35 = vpop.eup %854 }
  0xe7   :  { %v857_v36 = vpop.eup %856 }
  0xe8   :  { %v832_v37 = vpack.c.bf16 %v857_v36, %v855_v35  ;;  %v859_v38 = vpop.eup %858  ;;  %v711_v35 = vld [vmem:[%s1095_s3 + $0x58] sm:$0xff] }
  0xea   :  { %833 = vmatpush3.bf16.msra.mxu1 %v832_v37  ;;  %v496_v37 = vpop.permute.xlu0 %495 }
  0xeb   :  { %766 = vmatprep.subr.mxu1 %v884_v0 }
  0xee   :  { %767 = vmatpush3.msra.mxu1 %v859_v38 }
  0xef   :  { %769 = vmatmul.mubr.msk.f32.vlgmr.msra.gmra.mrb[2].mxu1 %vm162_vm2, %v141_v39  ;;  %837 = vmatprep.subr.bf16.mxu1 %v887_v22 }
  0xf0   :  { %771 = vmatprep.mubr.msk.f32.mxu1 %vm885_vm1, %v884_v0 }
  0xf3   :  { %772 = vmatmul.mubr.msk.f32.gmra.mrb[4].mxu1 %vm162_vm2, %v142_v40  ;;  %v501_v40 = vpop.permute.xlu1 %500 }
  0xf4   :  { %774 = vmatprep.mubr.msk.f32.mxu1 %vm885_vm1, %v884_v0 }
  0xf7   :  { %775 = vmatmul.mubr.msk.f32.gmra.mrb[6].mxu1 %vm162_vm2, %v143_v41 }
  0xf8   :  { %798 = vmatprep.mubr.msk.f32.mxu1 %vm885_vm1, %v884_v0 }
 0x1c2   :  { %v238_v42 = vpop.f32.mrb[2].mxu1 }
 0x1c3   :  { %v770_v44 = vpop.f32.mrb[3].mxu1  ;;  %v239_v45 = vadd.f32 %v238_v42, %v150_v43 }
 0x1c4   :  { %v506_v44 = vpop.permute.xlu0 %505 }
 0x1c5   :  { %860 = vtanh.f32 %v239_v45 }
 0x1c6   :  { %v243_v47 = vpop.f32.mrb[4].mxu1 }
 0x1c7   :  { %v244_v48 = vadd.f32 %v243_v47, %v155_v46  ;;  %v773_v49 = vpop.f32.mrb[5].mxu1 }
 0x1c9   :  { %862 = vtanh.f32 %v244_v48 }
 0x1ca   :  { %v248_v51 = vpop.f32.mrb[6].mxu1 }
 0x1cb   :  { %v249_v52 = vadd.f32 %v248_v51, %v160_v50  ;;  %v776_v53 = vpop.f32.mrb[7].mxu1  ;;  %v600_v51 = vld [vmem:[%s1096_s5] sm:$0xff] }
 0x1cc   :  { %v605_v53 = vpop.permute.xlu1 %604 }
 0x1cd   :  { %864 = vtanh.f32 %v249_v52 }
 0x1cf   :  { %v861_v54 = vpop.eup %860 }
 0x1d3   :  { %v863_v55 = vpop.eup %862 }
 0x1d4   :  { %v835_v56 = vpack.c.bf16 %v863_v55, %v861_v54 }
 0x1d6   :  { %836 = vmatpush3.bf16.msra.mxu0 %v835_v56 }
 0x1d7   :  { %781 = vmatprep.subr.mxu0 %v884_v0  ;;  %v865_v58 = vpop.eup %864 }
 0x1da   :  { %782 = vmatpush3.msra.mxu0 %v865_v58 }
 0x1db   :  { %784 = vmatmul.mubr.msk.f32.vlgmr.msra.gmra.mrb[4].mxu0 %vm162_vm2, %v691_v57  ;;  %840 = vmatprep.subr.bf16.mxu0 %v887_v22 }
 0x1dc   :  { %786 = vmatprep.mubr.msk.f32.mxu0 %vm885_vm1, %v884_v0 }
 0x1df   :  { %787 = vmatmul.mubr.msk.f32.gmra.mrb[6].mxu0 %vm162_vm2, %v692_v59 }
 0x1e0   :  { %789 = vmatprep.mubr.msk.f32.mxu0 %vm885_vm1, %v884_v0 }
 0x1e3   :  { %790 = vmatmul.mubr.msk.f32.gmra.mrb[8].mxu0 %vm162_vm2, %v693_v60 }
 0x1e4   :  { %813 = vmatprep.mubr.msk.f32.mxu0 %vm885_vm1, %v884_v0 }
 0x2ae   :  { %v353_v61 = vpop.f32.mrb[4].mxu0 }
 0x2af   :  { %v785_v63 = vpop.f32.mrb[5].mxu0  ;;  %v354_v1 = vadd.f32 %v353_v61, %v266_v62 }
 0x2b1   :  { %866 = vtanh.f32 %v354_v1 }
 0x2b2   :  { %v358_v3 = vpop.f32.mrb[6].mxu0 }
 0x2b3   :  { %v359_v4 = vadd.f32 %v358_v3, %v271_v2  ;;  %v788_v5 = vpop.f32.mrb[7].mxu0 }
 0x2b5   :  { %868 = vtanh.f32 %v359_v4 }
 0x2b6   :  { %v363_v7 = vpop.f32.mrb[8].mxu0 }
 0x2b7   :  { %v364_v8 = vadd.f32 %v363_v7, %v276_v6  ;;  %v791_v9 = vpop.f32.mrb[9].mxu0 }
 0x2b9   :  { %870 = vtanh.f32 %v364_v8 }
 0x2bb   :  { %v867_v10 = vpop.eup %866 }
 0x2bf   :  { %v869_v11 = vpop.eup %868 }
 0x2c0   :  { %v838_v12 = vpack.c.bf16 %v869_v11, %v867_v10 }
 0x2c2   :  { %839 = vmatpush3.bf16.msra.mxu1 %v838_v12 }
 0x2c3   :  { %796 = vmatprep.subr.mxu1 %v884_v0  ;;  %v871_v14 = vpop.eup %870 }
 0x2c6   :  { %797 = vmatpush3.msra.mxu1 %v871_v14 }
 0x2c7   :  { %799 = vmatmul.mubr.msk.f32.vlgmr.msra.gmra.mrb[8].mxu1 %vm162_vm2, %v700_v13  ;;  %843 = vmatprep.subr.bf16.mxu1 %v887_v22 }
 0x2c8   :  { %801 = vmatprep.mubr.msk.f32.mxu1 %vm885_vm1, %v884_v0 }
 0x2cb   :  { %802 = vmatmul.mubr.msk.f32.gmra.mrb[10].mxu1 %vm162_vm2, %v701_v15 }
 0x2cc   :  { %804 = vmatprep.mubr.msk.f32.mxu1 %vm885_vm1, %v884_v0 }
 0x2cf   :  { %805 = vmatmul.mubr.msk.f32.gmra.mrb[12].mxu1 %vm162_vm2, %v702_v16 }
 0x2d0   :  { %828 = vmatprep.mubr.msk.f32.mxu1 %vm885_vm1, %v884_v0 }
 0x39a   :  { %v468_v17 = vpop.f32.mrb[8].mxu1 }
 0x39b   :  { %v800_v19 = vpop.f32.mrb[9].mxu1  ;;  %v469_v20 = vadd.f32 %v468_v17, %v381_v18 }
 0x39d   :  { %872 = vtanh.f32 %v469_v20 }
 0x39e   :  { %v473_v22 = vpop.f32.mrb[10].mxu1 }
 0x39f   :  { %v474_v23 = vadd.f32 %v473_v22, %v386_v21  ;;  %v803_v24 = vpop.f32.mrb[11].mxu1 }
 0x3a1   :  { %874 = vtanh.f32 %v474_v23 }
 0x3a2   :  { %v478_v26 = vpop.f32.mrb[12].mxu1 }
 0x3a3   :  { %v479_v27 = vadd.f32 %v478_v26, %v391_v25  ;;  %v806_v28 = vpop.f32.mrb[13].mxu1 }
 0x3a5   :  { %876 = vtanh.f32 %v479_v27 }
 0x3a7   :  { %v873_v29 = vpop.eup %872 }
 0x3ab   :  { %v875_v30 = vpop.eup %874 }
 0x3ac   :  { %v841_v31 = vpack.c.bf16 %v875_v30, %v873_v29 }
 0x3ae   :  { %842 = vmatpush3.bf16.msra.mxu0 %v841_v31 }
 0x3af   :  { %811 = vmatprep.subr.mxu0 %v884_v0  ;;  %v877_v33 = vpop.eup %876 }
 0x3b2   :  { %812 = vmatpush3.msra.mxu0 %v877_v33 }
 0x3b3   :  { %814 = vmatmul.mubr.msk.f32.vlgmr.msra.gmra.mrb[10].mxu0 %vm162_vm2, %v709_v32 }
 0x3b4   :  { %816 = vmatprep.mubr.msk.f32.mxu0 %vm885_vm1, %v884_v0 }
 0x3b7   :  { %817 = vmatmul.mubr.msk.f32.gmra.mrb[12].mxu0 %vm162_vm2, %v710_v34 }
 0x3b8   :  { %819 = vmatprep.mubr.msk.f32.mxu0 %vm885_vm1, %v884_v0 }
 0x3bb   :  { %820 = vmatmul.mubr.msk.f32.gmra.mrb[14].mxu0 %vm162_vm2, %v711_v35 }
 0x486   :  { %v583_v36 = vpop.f32.mrb[10].mxu0 }
 0x487   :  { %v815_v38 = vpop.f32.mrb[11].mxu0  ;;  %v584_v39 = vadd.f32 %v583_v36, %v496_v37 }
 0x489   :  { %878 = vtanh.f32 %v584_v39 }
 0x48a   :  { %v588_v41 = vpop.f32.mrb[12].mxu0 }
 0x48b   :  { %v589_v42 = vadd.f32 %v588_v41, %v501_v40  ;;  %v818_v43 = vpop.f32.mrb[13].mxu0 }
 0x48d   :  { %880 = vtanh.f32 %v589_v42 }
 0x48e   :  { %v593_v45 = vpop.f32.mrb[14].mxu0 }
 0x48f   :  { %v594_v46 = vadd.f32 %v593_v45, %v506_v44  ;;  %v821_v47 = vpop.f32.mrb[15].mxu0 }
 0x491   :  { %882 = vtanh.f32 %v594_v46 }
 0x493   :  { %v879_v48 = vpop.eup %878 }
 0x497   :  { %v881_v49 = vpop.eup %880 }
 0x498   :  { %v844_v50 = vpack.c.bf16 %v881_v49, %v879_v48 }
 0x49a   :  { %845 = vmatpush3.bf16.msra.mxu1 %v844_v50 }
 0x49b   :  { %826 = vmatprep.subr.mxu1 %v884_v0  ;;  %v883_v52 = vpop.eup %882 }
 0x49e   :  { %827 = vmatpush3.msra.mxu1 %v883_v52 }
 0x49f   :  { %829 = vmatmul.mubr.msk.f32.vlgmr.msra.gmra.mrb[14].mxu1 %vm162_vm2, %v600_v51 }
 0x572   :  { %v676_v54 = vpop.f32.mrb[14].mxu1 }
 0x573   :  { %v677_v55 = vadd.f32 %v676_v54, %v605_v53  ;;  %v830_v56 = vpop.f32.mrb[15].mxu1 }
 0x575   :  { %680 = vst [vmem:[%s1097_s7] sm:$0xf] %v677_v55 }

</bundles_post_ra>
